<compile_context>
chip_gen: v6e
topology: v6e:2x2x1
jax: 0.10.0
libtpu: 0.0.40
codegen_flags: <defaults>
</compile_context>

<pallas_src>
import functools

import jax
import jax.numpy as jnp
from jax.experimental import pallas as pl
from jax.experimental.pallas import tpu as pltpu


# ----------------------------------------------------------------------------
# Fused Pallas kernel: backbone conv (im2col matmul) + ReLU + 1x1 decode head
#                      + bilinear resize.  One grid step = N_blk batch elements
#                      packed along lanes.
# ----------------------------------------------------------------------------
def _fused_encdec_kernel(x_ref, w1_ref, w2_ref, r_ref, o_ref):
    # x_ref : (1, K1p, NB*HW)   bf16  im2col patches; row K1 is constant 1.0
    # w1_ref: (C1+1, K1p)       bf16  backbone taps | b1 column | ones-row pick
    # w2_ref: (C2, C1+1)        bf16  decode-head weight | b2 column
    # r_ref : (HW, HWout)       bf16  bilinear resize operator  kron(Rh, Rw)^T
    # o_ref : (1, NB*C2, HWout) f32   lane-dense, 8-sublane output slab
    HW = r_ref.shape[0]
    NB = x_ref.shape[-1] // HW
    C2 = w2_ref.shape[0]

    patches = x_ref[0]                                               # (K1p, NB*HW)
    # backbone conv (+ folded b1) and ReLU; the b2-carrier row stays 1.0
    feat = jnp.dot(w1_ref[...], patches,
                   preferred_element_type=jnp.float32)               # (C1+1, NB*HW)
    feat = jnp.maximum(feat, 0.0)
    # decode head 1x1 conv (+ folded b2 via the carrier row)
    logits = jnp.dot(w2_ref[...], feat.astype(jnp.bfloat16),
                     preferred_element_type=jnp.float32)             # (C2, NB*HW)

    # Restack batch from lanes to sublanes on the tiny logits tensor so the
    # resize matmul emits an (NB*C2, HWout) slab (8 sublanes, 256 lanes).
    if NB == 1:
        stacked = logits
    else:
        stacked = jnp.concatenate(
            [logits[:, b * HW:(b + 1) * HW] for b in range(NB)], axis=0)

    out = jnp.dot(stacked.astype(jnp.bfloat16), r_ref[...],
                  preferred_element_type=jnp.float32)                # (NB*C2, HWout)
    o_ref[0] = out.astype(o_ref.dtype)
    del C2  # (kept for readability)


def fused_encoder_decoder(patches_t, w1, w2, r, n_blk, c2):
    G, K1p, NBHW = patches_t.shape
    C1p1 = w1.shape[0]
    HW, HWout = r.shape
    return pl.pallas_call(
        _fused_encdec_kernel,
        out_shape=jax.ShapeDtypeStruct((G, n_blk * c2, HWout), jnp.float32),
        grid=(G,),
        in_specs=[
            pl.BlockSpec((1, K1p, NBHW), lambda g: (g, 0, 0)),
            # Grid-invariant operands (constant index maps -> fetched once).
            pl.BlockSpec((C1p1, K1p), lambda g: (0, 0)),
            pl.BlockSpec((c2, C1p1), lambda g: (0, 0)),
            pl.BlockSpec((HW, HWout), lambda g: (0, 0)),
        ],
        out_specs=pl.BlockSpec((1, n_blk * c2, HWout), lambda g: (g, 0, 0)),
        compiler_params=pltpu.CompilerParams(
            dimension_semantics=("parallel",)),
    )(patches_t, w1, w2, r)


# ----------------------------------------------------------------------------
# JAX glue: im2col (transposed layout, bias-carrier row) and bilinear matrices
# ----------------------------------------------------------------------------
def im2col_t_3x3_s2_p1(x_nchw, k1_pad):
    """x (N,Cin,H,W) -> patches^T (N, k1_pad, Ho*Wo), tap order (kh, kw, cin).

    Row 9*Cin is set to 1.0 (bias carrier); remaining pad rows are zero.
    """
    N, Cin, H, W = x_nchw.shape
    Ho = (H + 2 - 3) // 2 + 1
    Wo = (W + 2 - 3) // 2 + 1
    xp = jnp.pad(x_nchw, ((0, 0), (0, 0), (1, 1), (1, 1)))
    taps = [xp[:, :, kh:kh + 2 * Ho:2, kw:kw + 2 * Wo:2]
            for kh in range(3) for kw in range(3)]
    p = jnp.stack(taps, axis=1).reshape(N, 9 * Cin, Ho * Wo)
    ones = jnp.ones((N, 1, Ho * Wo), p.dtype)
    zeros = jnp.zeros((N, k1_pad - 9 * Cin - 1, Ho * Wo), p.dtype)
    return jnp.concatenate([p, ones, zeros], axis=1), Ho, Wo


def interp_matrix(out_size, in_size):
    # PyTorch bilinear, align_corners=False (mmseg `resize` default)
    scale = in_size / out_size
    i = jnp.arange(out_size, dtype=jnp.float32)
    src = jnp.clip((i + 0.5) * scale - 0.5, 0.0, None)
    i0 = jnp.clip(jnp.floor(src).astype(jnp.int32), 0, in_size - 1)
    i1 = jnp.clip(i0 + 1, 0, in_size - 1)
    w1 = src - i0.astype(jnp.float32)
    w0 = 1.0 - w1
    return (w0[:, None] * jax.nn.one_hot(i0, in_size, dtype=jnp.float32) +
            w1[:, None] * jax.nn.one_hot(i1, in_size, dtype=jnp.float32))


# ----------------------------------------------------------------------------
# Encoder_Decoder forward
# ----------------------------------------------------------------------------
@functools.partial(jax.jit, static_argnames=("ori_size",))
def encoder_decoder_forward(x_nchw, params, ori_size):
    N, Cin, H, W = x_nchw.shape
    w_bb, b_bb, w_dh, b_dh = (params["w_bb"], params["b_bb"],
                              params["w_dh"], params["b_dh"])
    Cmid = w_bb.shape[0]
    num_classes = w_dh.shape[0]

    # --- im2col patches with bias-carrier row; K1p multiple of 16 (bf16 pack)
    K1 = 9 * Cin
    K1p = ((K1 + 1 + 15) // 16) * 16
    patches_t, Ho, Wo = im2col_t_3x3_s2_p1(x_nchw, K1p)       # (N, K1p, HW)
    HW = Ho * Wo

    # --- pack batch into the lane dimension (>=128 lanes per matmul)
    N_blk = N if N * HW <= 512 else max(1, 512 // HW)
    N_blk = max(1, min(N_blk, N))
    G = -(-N // N_blk)
    Npad = G * N_blk
    if Npad != N:
        patches_t = jnp.pad(patches_t, ((0, Npad - N), (0, 0), (0, 0)))
    patches_t = (patches_t.reshape(G, N_blk, K1p, HW)
                 .transpose(0, 2, 1, 3)
                 .reshape(G, K1p, N_blk * HW)
                 .astype(jnp.bfloat16))

    # --- backbone weight: (Cmid, Cin, 3, 3) -> (Cmid, 9*Cin), tap order
    #     (kh, kw, cin); b1 folded into the bias-carrier column, plus one extra
    #     "ones" row so b2 can ride through the second matmul.
    w1 = jnp.transpose(w_bb, (0, 2, 3, 1)).reshape(Cmid, K1)
    w1 = jnp.pad(w1, ((0, 0), (0, K1p - K1)))
    w1 = w1.at[:, K1].set(b_bb)                               # fold b1
    ones_row = jnp.zeros((1, K1p), w1.dtype).at[0, K1].set(1.0)
    w1 = jnp.concatenate([w1, ones_row], axis=0)              # (Cmid+1, K1p)

    w2 = w_dh.reshape(num_classes, Cmid)
    w2 = jnp.concatenate([w2, b_dh.reshape(num_classes, 1)], axis=1)  # fold b2

    # --- fused bilinear resize operator: out_plane_flat = plane_flat @ R
    Hout, Wout = ori_size
    rh = interp_matrix(Hout, Ho)                              # (Hout, Ho)
    rw = interp_matrix(Wout, Wo)                              # (Wout, Wo)
    r = jnp.kron(rh, rw).T                                    # (HW, Hout*Wout)

    out = fused_encoder_decoder(patches_t,
                                w1.astype(jnp.bfloat16),
                                w2.astype(jnp.bfloat16),
                                r.astype(jnp.bfloat16),
                                N_blk, num_classes)           # (G, N_blk*nc, HWout)
    out = out.reshape(Npad, num_classes, Hout, Wout)[:N]
    return out


# ----------------------------------------------------------------------------
# Pure-JAX reference (f32) for a correctness cross-check
# ----------------------------------------------------------------------------
def reference_forward(x, params, ori_size):
    w_bb, b_bb, w_dh, b_dh = (params["w_bb"], params["b_bb"],
                              params["w_dh"], params["b_dh"])
    feat = jax.lax.conv_general_dilated(
        x, w_bb, window_strides=(2, 2), padding=((1, 1), (1, 1)),
        dimension_numbers=("NCHW", "OIHW", "NCHW"))
    feat = jnp.maximum(feat + b_bb[None, :, None, None], 0.0)
    logits = jax.lax.conv_general_dilated(
        feat, w_dh, window_strides=(1, 1), padding="VALID",
        dimension_numbers=("NCHW", "OIHW", "NCHW"))
    logits = logits + b_dh[None, :, None, None]
    Hout, Wout = ori_size
    rh = interp_matrix(Hout, logits.shape[2])
    rw = interp_matrix(Wout, logits.shape[3])
    return jnp.einsum("nchw,Hh,Ww->ncHW", logits, rh, rw)


# ----------------------------------------------------------------------------
if __name__ == "__main__":
    N, Cin, H, W = 2, 3, 16, 16
    Cmid, num_classes = 16, 4
    ori_size = (16, 16)

    key = jax.random.PRNGKey(0)
    k_x, k_w1, k_b1, k_w2, k_b2 = jax.random.split(key, 5)

    x = jax.random.normal(k_x, (N, Cin, H, W), dtype=jnp.float32)
    params = {
        "w_bb": 0.1 * jax.random.normal(k_w1, (Cmid, Cin, 3, 3), jnp.float32),
        "b_bb": 0.1 * jax.random.normal(k_b1, (Cmid,), jnp.float32),
        "w_dh": 0.1 * jax.random.normal(k_w2, (num_classes, Cmid, 1, 1), jnp.float32),
        "b_dh": 0.1 * jax.random.normal(k_b2, (num_classes,), jnp.float32),
    }

    out = encoder_decoder_forward(x, params, ori_size)
    jax.block_until_ready(out)
    assert out.shape == (N, num_classes, ori_size[0], ori_size[1])

    ref = reference_forward(x, params, ori_size)
    assert jnp.allclose(out, ref, atol=5e-2, rtol=5e-2), (
        float(jnp.max(jnp.abs(out - ref))))
    print("KERNEL_OK")
</pallas_src>

<mosaic_0001>
module attributes {stable_mosaic.version = 11 : i64} {
  func.func @_fused_encdec_kernel(%arg0: i32, %arg1: memref<1x32x128xbf16, #tpu.memory_space<vmem>>, %arg2: memref<17x32xbf16, #tpu.memory_space<vmem>>, %arg3: memref<4x17xbf16, #tpu.memory_space<vmem>>, %arg4: memref<64x256xbf16, #tpu.memory_space<vmem>>, %arg5: memref<1x8x256xf32, #tpu.memory_space<vmem>>) attributes {dimension_semantics = [#tpu.dimension_semantics<parallel>], iteration_bounds = array<i64: 1>, scalar_prefetch = 0 : i64, scratch_operands = 0 : i64, tpu.core_type = #tpu.core_type<tc>, window_params = [{transform_indices = @transform_0, window_bounds = array<i64: 1, 32, 128>}, {pipeline_mode = #tpu.pipeline_mode<synchronous>, transform_indices = @transform_1, window_bounds = array<i64: 17, 32>}, {pipeline_mode = #tpu.pipeline_mode<synchronous>, transform_indices = @transform_2, window_bounds = array<i64: 4, 17>}, {pipeline_mode = #tpu.pipeline_mode<synchronous>, transform_indices = @transform_3, window_bounds = array<i64: 64, 256>}, {transform_indices = @transform_4, window_bounds = array<i64: 1, 8, 256>}]} {
    %c0 = arith.constant 0 : index
    %c0_0 = arith.constant 0 : index
    %c0_1 = arith.constant 0 : index
    %0 = vector.load %arg1[%c0, %c0_0, %c0_1] : memref<1x32x128xbf16, #tpu.memory_space<vmem>>, vector<1x32x128xbf16>
    %1 = vector.shape_cast %0 : vector<1x32x128xbf16> to vector<32x128xbf16>
    %c0_2 = arith.constant 0 : index
    %c0_3 = arith.constant 0 : index
    %2 = vector.load %arg2[%c0_2, %c0_3] : memref<17x32xbf16, #tpu.memory_space<vmem>>, vector<17x32xbf16>
    %cst = arith.constant dense<0.000000e+00> : vector<17x128xf32>
    %3 = tpu.matmul %2, %1, %cst {dimension_numbers = #tpu.dot_dimension_numbers<[1], [0], [0], [1], [0, 0, 1, 1], [], []>} : vector<17x32xbf16>, vector<32x128xbf16>, vector<17x128xf32> -> vector<17x128xf32>
    %cst_4 = arith.constant 0.000000e+00 : f32
    %4 = vector.broadcast %cst_4 : f32 to vector<17x128xf32>
    %5 = arith.maximumf %3, %4 : vector<17x128xf32>
    %c0_5 = arith.constant 0 : index
    %c0_6 = arith.constant 0 : index
    %6 = vector.load %arg3[%c0_5, %c0_6] : memref<4x17xbf16, #tpu.memory_space<vmem>>, vector<4x17xbf16>
    %7 = arith.truncf %5 : vector<17x128xf32> to vector<17x128xbf16>
    %cst_7 = arith.constant dense<0.000000e+00> : vector<4x128xf32>
    %8 = tpu.matmul %6, %7, %cst_7 {dimension_numbers = #tpu.dot_dimension_numbers<[1], [0], [0], [1], [0, 0, 1, 1], [], []>} : vector<4x17xbf16>, vector<17x128xbf16>, vector<4x128xf32> -> vector<4x128xf32>
    %9 = vector.extract_strided_slice %8 {offsets = [0, 0], sizes = [4, 64], strides = [1, 1]} : vector<4x128xf32> to vector<4x64xf32>
    %10 = vector.extract_strided_slice %8 {offsets = [0, 64], sizes = [4, 64], strides = [1, 1]} : vector<4x128xf32> to vector<4x64xf32>
    %11 = tpu.concatenate %9, %10 in 0 : vector<4x64xf32>, vector<4x64xf32> -> vector<8x64xf32>
    %12 = arith.truncf %11 : vector<8x64xf32> to vector<8x64xbf16>
    %c0_8 = arith.constant 0 : index
    %c0_9 = arith.constant 0 : index
    %13 = vector.load %arg4[%c0_8, %c0_9] : memref<64x256xbf16, #tpu.memory_space<vmem>>, vector<64x256xbf16>
    %cst_10 = arith.constant dense<0.000000e+00> : vector<8x256xf32>
    %14 = tpu.matmul %12, %13, %cst_10 {dimension_numbers = #tpu.dot_dimension_numbers<[1], [0], [0], [1], [0, 0, 1, 1], [], []>} : vector<8x64xbf16>, vector<64x256xbf16>, vector<8x256xf32> -> vector<8x256xf32>
    %c0_11 = arith.constant 0 : index
    %c0_12 = arith.constant 0 : index
    %c0_13 = arith.constant 0 : index
    %15 = vector.load %arg5[%c0_11, %c0_12, %c0_13] : memref<1x8x256xf32, #tpu.memory_space<vmem>>, vector<1x8x256xf32>
    %16 = vector.shape_cast %15 : vector<1x8x256xf32> to vector<8x256xf32>
    %17 = vector.shape_cast %14 : vector<8x256xf32> to vector<1x8x256xf32>
    tpu.vector_store %arg5[%c0_11, %c0_12, %c0_13], %17 {strides = array<i32>} : memref<1x8x256xf32, #tpu.memory_space<vmem>>, vector<1x8x256xf32>,
    return
  }
  func.func @transform_0(%arg0: i32) -> (i32, i32, i32) {
    %c0_i32 = arith.constant 0 : i32
    %c0_i32_0 = arith.constant 0 : i32
    %c0_i32_1 = arith.constant 0 : i32
    return %arg0, %c0_i32, %c0_i32_0 : i32, i32, i32
  }
  func.func @transform_1(%arg0: i32) -> (i32, i32) {
    %c0_i32 = arith.constant 0 : i32
    %c0_i32_0 = arith.constant 0 : i32
    %c0_i32_1 = arith.constant 0 : i32
    return %c0_i32, %c0_i32_0 : i32, i32
  }
  func.func @transform_2(%arg0: i32) -> (i32, i32) {
    %c0_i32 = arith.constant 0 : i32
    %c0_i32_0 = arith.constant 0 : i32
    %c0_i32_1 = arith.constant 0 : i32
    return %c0_i32, %c0_i32_0 : i32, i32
  }
  func.func @transform_3(%arg0: i32) -> (i32, i32) {
    %c0_i32 = arith.constant 0 : i32
    %c0_i32_0 = arith.constant 0 : i32
    %c0_i32_1 = arith.constant 0 : i32
    return %c0_i32, %c0_i32_0 : i32, i32
  }
  func.func @transform_4(%arg0: i32) -> (i32, i32, i32) {
    %c0_i32 = arith.constant 0 : i32
    %c0_i32_0 = arith.constant 0 : i32
    %c0_i32_1 = arith.constant 0 : i32
    return %arg0, %c0_i32, %c0_i32_0 : i32, i32, i32
  }
}

</mosaic_0001>

<bundles_post_ra>
// kernel: encoder_decoder_forward.1
= control target key start
LH: loop header
LB: loop body
LE: loop exit
PB: predicated region body
PF: predicated region fallthrough
CT: control target
= control target key end

     0   :  { %vm45_vm0 = vcmask 261120   ;;  %v322_v4 = vmov 0   ;;  %v323_v5 = vmov 0.0   ;;  %vm324_vm1 = vmmov 0   ;;  %s325_s12 = smov 64   ;;  %s396_s0 = inlined_call_operand.vmem [shape: bf16[1,32,128], index: 0, kind: input, shape index: {}]   ;;  %s397_s1 = inlined_call_operand.vmem [shape: bf16[17,32], index: 1, kind: input, shape index: {}]   ;;  %s398_s2 = inlined_call_operand.vmem [shape: bf16[4,17], index: 2, kind: input, shape index: {}]   ;;  %s399_s3 = inlined_call_operand.vmem [shape: bf16[64,256], index: 3, kind: input, shape index: {}]   ;;  %s400_s4 = inlined_call_operand.vmem [shape: f32[1,8,256], index: 4, kind: output, shape index: {}]  }
   0x1   :  { %v306_v0 = vld [vmem:[%s396_s0 + $0x8] sm:$0xff]   ;;  %v307_v1 = vld [vmem:[%s396_s0] sm:$0xff]   ;;  %248 = vmatprep.mubr.bf16.mxu0 %v322_v4  ;;  %vm110_vm2 = vcmask 1040384   ;;  %vm106_vm3 = vcmask 138240   ;;  %v310_v18 = vld [vmem:[%s399_s3 + $0x34] ss:$8 sps:$4 sm:$0xff]  }
   0x2   :  { %286 = vmatprep.subr.bf16.mxu1 %v306_v0  ;;  %v308_v2 = vld [vmem:[%s397_s1] sm:$0xff]   ;;  %v309_v3 = vld [vmem:[%s397_s1 + $0x8] ss:$0 sps:$4 sm:$0x11]   ;;  %v112_v8 = vsel %vm110_vm2, 65535, %v322_v4  ;;  %224 = vmatprep.subr.bf16.mxu0 %v310_v18  ;;  %vm161_vm4 = vcmask 1043456  }
   0x3   :  { %287 = vmatpush3.bf16.msra.mxu1 %v306_v0  ;;  %290 = vmatprep.mubr.msk.bf16.mxu1 %vm45_vm0, %v308_v2  ;;  %v103_v17 = vld [vmem:[%s398_s2] sm:$0x3]  ;;  %v312_v19 = vld [vmem:[%s399_s3 + $0x30] ss:$8 sps:$4 sm:$0xff]   ;;  %v313_v20 = vld [vmem:[%s399_s3 + $0x24] ss:$8 sps:$4 sm:$0xff]  }
   0x4   :  { %288 = vmatprep.subr.bf16.mxu1 %v307_v1  ;;  %225 = vmatpush1.bf16.msra.mxu0 %v312_v19  ;;  %v315_v21 = vld [vmem:[%s399_s3 + $0x20] ss:$8 sps:$4 sm:$0xff]   ;;  %v316_v22 = vld [vmem:[%s399_s3 + $0x14] ss:$8 sps:$4 sm:$0xff]   ;;  %v318_v23 = vld [vmem:[%s399_s3 + $0x10] ss:$8 sps:$4 sm:$0xff]  }
   0x5   :  { %226 = vmatprep.subr.bf16.mxu0 %v313_v20  ;;  %v319_v24 = vld [vmem:[%s399_s3 + $0x4] ss:$8 sps:$4 sm:$0xff]   ;;  %v321_v25 = vld [vmem:[%s399_s3] ss:$8 sps:$4 sm:$0xff]   ;;  %vm212_vm5 = vcmask 523264  }
   0x7   :  { %289 = vmatpush3.bf16.msra.mxu1 %v307_v1 }
   0x8   :  { %294 = vmatprep.subr.bf16.mxu1 %v323_v5  ;;  %227 = vmatpush1.bf16.msra.mxu0 %v315_v21 }
   0x9   :  { %228 = vmatprep.subr.bf16.mxu0 %v316_v22 }
   0xa   :  { %291 = vmatmul.mubr.msk.bf16.vlgmr.msra.gmra.mxu1 %vm45_vm0, %v309_v3 }
   0xb   :  { %298 = vmatprep.mubr.msk.bf16.mxu1 %vm324_vm1, %v323_v5 }
   0xc   :  { %229 = vmatpush1.bf16.msra.mxu0 %v318_v23 }
   0xd   :  { %230 = vmatprep.subr.bf16.mxu0 %v319_v24 }
  0x10   :  { %231 = vmatpush1.bf16.msra.mxu0 %v321_v25 }
  0xca   :  { %v292_v6 = vpop.f32.mrf.mxu1 }
  0xcb   :  { %v102_v7 = vmax.f32 %v292_v6, 0.0 }
  0xcc   :  { %v86_v9 = vpop.f32.mrf.mxu1 }
  0xcd   :  { %v105_v10 = vpack.c.bf16 %v102_v7, %v102_v7  ;;  %v100_v14 = vmax.f32 %v86_v9, 0.0 }
  0xce   :  { %v293_v11 = vpop.f32.mrf.mxu1 }
  0xcf   :  { %v114_v12 = vand.u32 %v112_v8, %v105_v10 }
  0xd0   :  { %v89_v13 = vpop.f32.mrf.mxu1 }
  0xd1   :  { %v101_v15 = vmax.f32 %v89_v13, 0.0  ;;  %295 = vmatpush3.bf16.msra.mxu1 %v114_v12 }
  0xd2   :  { %296 = vmatprep.subr.bf16.mxu1 %v323_v5 }
  0xd3   :  { %v104_v16 = vpack.c.bf16 %v101_v15, %v100_v14 }
  0xd5   :  { %297 = vmatpush3.bf16.msra.mxu1 %v104_v16 }
  0xd8   :  { %299 = vmatmul.mubr.msk.bf16.vlgmr.msra.gmra.mxu1 %vm106_vm3, %v103_v17 }
 0x198   :  { %v150_v26 = vpop.f32.mrf.mxu1 }
 0x199   :  { %v157_v27 = vrot.slane %v150_v26, 4 }
 0x19a   :  { %v300_v28 = vpop.f32.mrf.mxu1 }
 0x19b   :  { %158 = vrot.lane.b32.xlu0 %v157_v27, %s325_s12 }
 0x19c   :  { %v153_v29 = vpop.f32.mrf.mxu1 }
 0x19e   :  { %v301_v30 = vpop.f32.mrf.mxu1 }
 0x20d   :  { %v159_v31 = vpop.permute.xlu0 %158 }
 0x20e   :  { %v162_v32 = vsel %vm161_vm4, %v150_v26, %v159_v31 }
 0x20f   :  { %v163_v33 = vpack.c.bf16 %v162_v32, %v162_v32 }
 0x211   :  { %278 = vmatmul.mubr.msk.bf16.vlgmr.msra.gmra.mxu0 %vm212_vm5, %v163_v33 }
 0x2d1   :  { %v250_v34 = vpop.f32.mrf.mxu0 }
 0x2d2   :  { %257 = vst [vmem:[%s400_s4] sm:$0xff] %v250_v34 }
 0x2d3   :  { %v252_v35 = vpop.f32.mrf.mxu0 }
 0x2d4   :  { %258 = vst [vmem:[%s400_s4 + $0x8] sm:$0xff] %v252_v35 }
 0x2d5   :  { %v254_v36 = vpop.f32.mrf.mxu0 }
 0x2d7   :  { %v255_v37 = vpop.f32.mrf.mxu0 }

</bundles_post_ra>
